<compile_context>
chip_gen: v7x
topology: tpu7x:2x2x1
jax: 0.10.0
libtpu: 0.0.40
codegen_flags: <defaults>
</compile_context>

<pallas_src>
import functools

import jax
import jax.numpy as jnp
from jax.experimental import pallas as pl
from jax.experimental.pallas import tpu as pltpu


# ---------------------------------------------------------------------------
# Kernels
# ---------------------------------------------------------------------------
def _sigmoid_kernel(cls_ref, out_ref):
    """classes = sigmoid(x) = 0.5 * tanh(0.5 * x) + 0.5  (one EUP op)."""
    x = cls_ref[...].astype(jnp.float32)
    out_ref[...] = (0.5 * jnp.tanh(0.5 * x) + 0.5).astype(out_ref.dtype)


def _diff_topk_kernel(cls_ref, out_ref, *, k, temperature):
    """differentiable_topk: k rounds of (softmax -> take top-1 -> mask),
    summed into a sparse per-row map of the top-k softmax values.

    Optimized form:
      - softmax is shift-invariant, so the per-iteration re-softmax over the
        -inf-masked input equals e_j / (running sum of unmasked e) with
        e = exp(x/T - rowmax) computed once.
      - argmax + lowest-index tie-break is a single XLU max over a packed
        int32 key: high bits = f32 bits of e (monotone since e > 0), low
        idx_bits = reversed lane index.  (Values equal up to 2^idx_bits ulps
        are treated as ties — measure-zero for normal-initialized cls.)
    """
    n, dim = out_ref.shape
    inv_t = float(1.0 / temperature)            # static: multiply, never divide
    idx_bits = max(1, (dim - 1).bit_length())   # bits needed to hold a lane index
    key_mask = jnp.int32(-(1 << idx_bits))      # clears the low idx_bits bits
    tie_hi = (1 << idx_bits) - 1

    lane_iota = jax.lax.broadcasted_iota(jnp.int32, (n, dim), 1)
    tie = tie_hi - lane_iota                    # higher tie value = lower index

    xt = cls_ref[...].astype(jnp.float32) * inv_t
    m0 = jnp.max(xt, axis=-1, keepdims=True)            # XLU (once)
    e = jnp.exp(xt - m0)                                 # EUP (once); e in (0, 1]
    s_sum = jnp.sum(e, axis=-1, keepdims=True)           # XLU (once): running denom

    # Packed sort key (computed once, maintained across iterations).
    key = (pltpu.bitcast(e, jnp.int32) & key_mask) | tie

    acc = jnp.zeros((n, dim), jnp.float32)

    # k is a small static Python int -> unrolled loop (live ranges stay well
    # within 64 vregs at this tile size).
    for i in range(k):
        key_max = jnp.max(key, axis=-1, keepdims=True)   # single XLU reduce / iter
        one_hot = key == key_max
        inv_s = pl.reciprocal(s_sum, approx=True)        # EUP, frees VALU
        # one-hot positions are disjoint across iterations -> select, no add.
        acc = jnp.where(one_hot, e * inv_s, acc)
        if i != k - 1:
            if i == 0:
                # e = exp(xt - m0) peaks at exactly 1.0 -> removed mass is 1.0.
                e_max = jnp.float32(1.0)
            else:
                # Recover e_max from the key (low idx_bits of mantissa zeroed:
                # <= 2^idx_bits ulps low; negligible vs. the 1e-3 tolerance).
                e_max = pltpu.bitcast(key_max & key_mask, jnp.float32)
            s_sum = s_sum - e_max                         # drop its softmax mass
            key = jnp.where(one_hot, jnp.int32(-(2 ** 31)), key)  # "mask -inf"

    out_ref[...] = acc


# ---------------------------------------------------------------------------
# Wrappers (single ungridded pallas_call; whole array is one block)
# ---------------------------------------------------------------------------
def sigmoid_classes(cls):
    n, dim = cls.shape
    return pl.pallas_call(
        _sigmoid_kernel,
        out_shape=jax.ShapeDtypeStruct((n, dim), cls.dtype),
        in_specs=[pl.BlockSpec((n, dim), lambda: (0, 0))],
        out_specs=pl.BlockSpec((n, dim), lambda: (0, 0)),
    )(cls)


def differentiable_topk_classes(cls, k, temperature):
    n, dim = cls.shape
    kern = functools.partial(_diff_topk_kernel, k=int(k), temperature=float(temperature))
    return pl.pallas_call(
        kern,
        out_shape=jax.ShapeDtypeStruct((n, dim), jnp.float32),
        in_specs=[pl.BlockSpec((n, dim), lambda: (0, 0))],
        out_specs=pl.BlockSpec((n, dim), lambda: (0, 0)),
    )(cls)


class Latents:
    """JAX/Pallas port of big_sleep.Latents (parameters initialized in-script)."""

    def __init__(self, num_latents=16, num_classes=256, z_dim=128,
                 max_classes=None, class_temperature=2.0, key=None):
        if key is None:
            key = jax.random.PRNGKey(0)
        k1, k2 = jax.random.split(key)
        # torch: zeros(num_latents, z_dim).normal_(std=1)
        self.normu = jax.random.normal(k1, (num_latents, z_dim), jnp.float32)
        # torch: zeros(num_latents, num_classes).normal_(mean=-3.9, std=0.3)
        self.cls = jax.random.normal(k2, (num_latents, num_classes), jnp.float32) * 0.3 - 3.9
        self.thresh_lat = jnp.asarray(1)  # registered buffer (unused in forward)
        assert max_classes is None or (0 < max_classes <= num_classes), \
            f"max_classes must be between 0 and {num_classes}"
        self.max_classes = max_classes
        self.class_temperature = class_temperature

    def forward(self):
        if self.max_classes is not None:
            classes = differentiable_topk_classes(
                self.cls, self.max_classes, self.class_temperature)
        else:
            classes = sigmoid_classes(self.cls)
        # normu is returned as-is (parameter passthrough — pure glue, no kernel).
        return self.normu, classes


# ---------------------------------------------------------------------------
# Pure-JAX references (mirror the original PyTorch, recomputing softmax each
# iteration) for the correctness check.
# ---------------------------------------------------------------------------
def _ref_differentiable_topk(x, k, temperature):
    n, dim = x.shape
    acc = jnp.zeros_like(x)
    for i in range(k):
        s = jax.nn.softmax(x / temperature, axis=-1)
        idx = jnp.argmax(s, axis=-1)
        v = jnp.max(s, axis=-1)
        one_hot = jax.nn.one_hot(idx, dim, dtype=x.dtype)
        acc = acc + one_hot * v[:, None]
        if i != k - 1:
            x = jnp.where(one_hot > 0, -jnp.inf, x)
    return acc


if __name__ == "__main__":
    # Small, TPU-tile-friendly shapes consistent with the module defaults
    # (num_latents multiple of 8, feature dims multiples of 128).
    NUM_LATENTS, NUM_CLASSES, Z_DIM = 16, 256, 128

    key = jax.random.PRNGKey(0)

    # Path 1: max_classes = None -> sigmoid
    lat_sig = Latents(NUM_LATENTS, NUM_CLASSES, Z_DIM, max_classes=None, key=key)
    normu, classes_sig = lat_sig.forward()
    jax.block_until_ready((normu, classes_sig))

    # Path 2: max_classes = 3 -> differentiable_topk with temperature 2.0
    lat_topk = Latents(NUM_LATENTS, NUM_CLASSES, Z_DIM, max_classes=3,
                       class_temperature=2.0, key=key)
    normu2, classes_topk = lat_topk.forward()
    jax.block_until_ready((normu2, classes_topk))

    # Correctness vs pure-JAX references.  Tolerance 1e-3 covers the approx
    # EUP reciprocal (~2^-12 rel err) and the packed-key e_max extraction.
    ref_sig = jax.nn.sigmoid(lat_sig.cls)
    ref_topk = _ref_differentiable_topk(lat_topk.cls, 3, 2.0)
    assert classes_sig.shape == (NUM_LATENTS, NUM_CLASSES)
    assert classes_topk.shape == (NUM_LATENTS, NUM_CLASSES)
    assert normu.shape == (NUM_LATENTS, Z_DIM)
    assert jnp.allclose(classes_sig, ref_sig, atol=1e-3, rtol=1e-3)
    assert jnp.allclose(classes_topk, ref_topk, atol=1e-3, rtol=1e-3)

    print("KERNEL_OK")
</pallas_src>

<mosaic_0001>
module attributes {stable_mosaic.version = 11 : i64} {
  func.func @_sigmoid_kernel(%arg0: memref<16x256xf32, #tpu.memory_space<vmem>>, %arg1: memref<16x256xf32, #tpu.memory_space<vmem>>) attributes {dimension_semantics = [], scalar_prefetch = 0 : i64, scratch_operands = 0 : i64, tpu.core_type = #tpu.core_type<tc>} {
    %c0 = arith.constant 0 : index
    %c0_0 = arith.constant 0 : index
    %0 = vector.load %arg0[%c0, %c0_0] : memref<16x256xf32, #tpu.memory_space<vmem>>, vector<16x256xf32>
    %cst = arith.constant 5.000000e-01 : f32
    %1 = vector.broadcast %cst : f32 to vector<16x256xf32>
    %2 = arith.mulf %1, %0 : vector<16x256xf32>
    %3 = math.tanh %2 : vector<16x256xf32>
    %cst_1 = arith.constant 5.000000e-01 : f32
    %4 = vector.broadcast %cst_1 : f32 to vector<16x256xf32>
    %5 = arith.mulf %4, %3 : vector<16x256xf32>
    %cst_2 = arith.constant 5.000000e-01 : f32
    %6 = vector.broadcast %cst_2 : f32 to vector<16x256xf32>
    %7 = arith.addf %5, %6 : vector<16x256xf32>
    %c0_3 = arith.constant 0 : index
    %c0_4 = arith.constant 0 : index
    %8 = vector.load %arg1[%c0_3, %c0_4] : memref<16x256xf32, #tpu.memory_space<vmem>>, vector<16x256xf32>
    tpu.vector_store %arg1[%c0_3, %c0_4], %7 {strides = array<i32>} : memref<16x256xf32, #tpu.memory_space<vmem>>, vector<16x256xf32>,
    return
  }
}

</mosaic_0001>

<bundles_post_ra>
// kernel: tpu_custom_call.1
= control target key start
LH: loop header
LB: loop body
LE: loop exit
PB: predicated region body
PF: predicated region fallthrough
CT: control target
= control target key end

     0   :  { %6 = vsyncpa [#allocation3], 0  ;;  %s168_s0 = inlined_call_operand.hbm [shape: f32[16,256], index: 0, kind: input, shape index: {}]   ;;  %s169_s1 = inlined_call_operand.hbm [shape: f32[16,256], index: 1, kind: output, shape index: {}]  }
   0x1   :  { %7 = vsyncpa [#allocation4], 0  ;;  %s124_s6 = smov [#allocation2]   ;;  %s76_s10 = scalar_lea.hbm %s168_s0, 512 }
   0x2   :  { %s13_s7 = sshll.u32 %s124_s6, 4  ;;  %p77_p0 = scmp.ne.s32.totalorder %s168_s0, %s76_s10  ;;  %s14_s7 = int_to_ptr.vmem [resolvable:$true] %s13_s7 }
   0x3   :  { %p80_p1 = scmp.lt.u32.totalorder %s76_s10, %s168_s0 }
   0x5   :  { %p82_p2 = pnand %p80_p1, %p77_p0 }
   0x7   :  { %85 = shalt.err (!%p82_p2)
}
   0x8   :  { %s86_s15 = scalar_lea.vmem %s14_s7, 512  ;;  %p91_p4 = scmp.lt.s32.totalorder %s14_s7, %s14_s7 }
   0x9   :  { %p87_p3 = scmp.ne.s32.totalorder %s14_s7, %s86_s15  ;;  %p92_p5 = scmp.lt.s32.totalorder %s86_s15, %s86_s15 }
   0xb   :  { %p93_p6 = por %p92_p5, %p91_p4 }
   0xd   :  { %p94_p7 = pnand %p93_p6, %p87_p3 }
   0xf   :  { %97 = shalt.err (!%p94_p7)
}
  0x10   :  { %s125_s16 = smov 256   ;;  %s126_s17 = smov 16  }
  0x11   :  { %19 = dma.hbm_to_vmem [thread:$0]  %s168_s0, 512, %s14_s7, [#allocation3], %s125_s16, %s125_s16, %s126_s17  }
  0x12   :  { %120 = dma.done.wait [#allocation3], 512  }
  0x13   :  { %121 = vsyncadd [#allocation3], 4294966784  ;;  %v23_v0 = vld [vmem:[#allocation2] sm:$0xff]  ;;  %v24_v1 = vld [vmem:[#allocation2 + $0x8] sm:$0xff]  ;;  %s127_s0 = smov [#allocation5]  }
  0x14   :  { %v25_v2 = vld [vmem:[#allocation2 + $0x10] sm:$0xff]  ;;  %v27_v3 = vmul.f32 0.5, %v23_v0  ;;  %v28_v4 = vmul.f32 0.5, %v24_v1  ;;  %v26_v6 = vld [vmem:[#allocation2 + $0x18] sm:$0xff]  ;;  %s52_s20 = sshll.u32 %s127_s0, 4  ;;  %s53_s20 = int_to_ptr.vmem [resolvable:$true] %s52_s20 }
  0x15   :  { %v29_v5 = vmul.f32 0.5, %v25_v2  ;;  %v30_v7 = vmul.f32 0.5, %v26_v6  ;;  %s98_s21 = scalar_lea.vmem %s53_s20, 512  ;;  %p103_p9 = scmp.lt.s32.totalorder %s53_s20, %s53_s20 }
  0x16   :  { %68 = vtanh.f32 %v27_v3  ;;  %p99_p8 = scmp.ne.s32.totalorder %s53_s20, %s98_s21  ;;  %p104_p10 = scmp.lt.s32.totalorder %s98_s21, %s98_s21 }
  0x17   :  { %70 = vtanh.f32 %v28_v4 }
  0x18   :  { %72 = vtanh.f32 %v29_v5  ;;  %p105_p11 = por %p104_p10, %p103_p9 }
  0x19   :  { %74 = vtanh.f32 %v30_v7 }
  0x1a   :  { %p106_p12 = pnand %p105_p11, %p99_p8 }
  0x20   :  { %v69_v8 = vpop.eup %68 }
  0x21   :  { %v71_v9 = vpop.eup %70  ;;  %v35_v10 = vmul.f32 0.5, %v69_v8 }
  0x22   :  { %v73_v11 = vpop.eup %72  ;;  %v36_v12 = vmul.f32 0.5, %v71_v9 }
  0x23   :  { %v75_v13 = vpop.eup %74  ;;  %v39_v14 = vadd.f32 0.5, %v35_v10  ;;  %v37_v15 = vmul.f32 0.5, %v73_v11 }
  0x24   :  { %v40_v16 = vadd.f32 0.5, %v36_v12  ;;  %v38_v17 = vmul.f32 0.5, %v75_v13 }
  0x25   :  { %43 = vst [vmem:[#allocation5] sm:$0xff] %v39_v14  ;;  %v41_v18 = vadd.f32 0.5, %v37_v15 }
  0x26   :  { %44 = vst [vmem:[#allocation5 + $0x8] sm:$0xff] %v40_v16  ;;  %v42_v19 = vadd.f32 0.5, %v38_v17 }
  0x27   :  { %45 = vst [vmem:[#allocation5 + $0x10] sm:$0xff] %v41_v18 }
  0x28   :  { %46 = vst [vmem:[#allocation5 + $0x18] sm:$0xff] %v42_v19 }
  0x29   :  { %109 = shalt.err (!%p106_p12)
}
  0x2a   :  { %s110_s24 = scalar_lea.hbm %s169_s1, 512 }
  0x2b   :  { %p111_p13 = scmp.ne.s32.totalorder %s169_s1, %s110_s24  ;;  %p114_p0 = scmp.lt.u32.totalorder %s110_s24, %s169_s1 }
  0x2d   :  { %p116_p1 = pnand %p114_p0, %p111_p13 }
  0x2f   :  { %119 = shalt.err (!%p116_p1)
}
  0x30   :  { %58 = dma.vmem_to_hbm [thread:$0]  %s53_s20, 512, %s169_s1, [#allocation4], %s125_s16, %s125_s16, %s126_s17  }
  0x31   :  { %122 = dma.done.wait [#allocation4], 512  }
  0x32   :  { %123 = vsyncadd [#allocation4], 4294966784 }
  0x33   :  { %62 = vsyncpa [#allocation3], 1 }
  0x34   :  { %63 = vsyncpa [#allocation4], 1 }

</bundles_post_ra>
